<compile_context>
chip_gen: v7x
topology: tpu7x:2x2x1
jax: 0.10.0
libtpu: 0.0.40
codegen_flags: <defaults>
</compile_context>

<pallas_src>
import functools

import jax
import jax.numpy as jnp
from jax.experimental import pallas as pl
from jax.experimental.pallas import tpu as pltpu


def _round_up(x, m):
    return (x + m - 1) // m * m


def _lse_latent_kernel(alpha_ref, z_ref, e_t_ref, z_out_ref, lse_ref,
                       esq_ref, m_run_ref, s_run_ref, *, n_valid):
    """One (m_tile, n_tile) grid step: fused tanh + scaled-distance + online LSE.

    Grid = (num_m_tiles, num_n_tiles); m is 'parallel', n (the logsumexp
    reduction over rows of z) is 'arbitrary' and iterates innermost so the
    e^T tile and the running LSE state stay resident across the reduction.
    """
    n_idx = pl.program_id(1)
    n_last = pl.num_programs(1) - 1

    alpha = alpha_ref[0]                                     # scalar f32 (SMEM)

    # ---- tanh hot path (needed for the distance anyway); lane-dense store ----
    # NOTE: for m > 0 the same tanh block is re-stored; identical values, so
    # this only costs redundant HBM writeback when M has multiple tiles.
    th = jnp.tanh(z_ref[...].astype(jnp.float32))            # (tn, Dp)
    z_out_ref[...] = th.astype(z_out_ref.dtype)

    # ---- per-M-tile init: running LSE state + hoisted alpha*||e||^2 bias -----
    @pl.when(n_idx == 0)
    def _init():
        e_t = e_t_ref[...]                                   # (Dp, tm) f32
        esq_ref[...] = alpha * jnp.sum(e_t * e_t, axis=0, keepdims=True)
        m_run_ref[...] = jnp.full(m_run_ref.shape, -1e30, dtype=jnp.float32)
        s_run_ref[...] = jnp.zeros(s_run_ref.shape, dtype=jnp.float32)

    # ---- s = alpha * ||tanh(z) - e||^2 with scalars folded into the matmul ---
    #   s = (-2*alpha) * th @ e^T  +  alpha*||th||^2  +  alpha*||e||^2
    a = th * (-2.0 * alpha)                                  # (tn, Dp) small VPU pass
    cross = jnp.dot(a, e_t_ref[...],
                    preferred_element_type=jnp.float32)      # (tn, tm) MXU, f32
    sq_m = jnp.sum(th * th, axis=1, keepdims=True)           # (tn, 1)

    tn = th.shape[0]
    rows = n_idx * tn + jax.lax.broadcasted_iota(jnp.int32, (tn, 1), 0)
    # fold the N-padding row mask into the (tn, 1) row bias -> no extra (tn, tm) pass
    bias_row = alpha * sq_m + jnp.where(rows < n_valid, 0.0, -1e30)
    s_blk = cross + bias_row + esq_ref[...]                  # (tn, tm)

    # ---- online logsumexp over the N (reduction) axis -------------------------
    blk_max = jnp.max(s_blk, axis=0, keepdims=True)          # (1, tm)
    new_max = jnp.maximum(m_run_ref[...], blk_max)
    s_run_ref[...] = (s_run_ref[...] * jnp.exp(m_run_ref[...] - new_max)
                      + jnp.sum(jnp.exp(s_blk - new_max), axis=0, keepdims=True))
    m_run_ref[...] = new_max

    # ---- finalize this M tile: per-column LSE, written once per m sweep -------
    @pl.when(n_idx == n_last)
    def _finalize():
        lse_ref[...] = m_run_ref[...] + jnp.log(s_run_ref[...])   # (1, tm)


def _sample_randomness(key, M, z_dim):
    k1, k2 = jax.random.split(key)
    # torch.rand(1) * 2 - 3        ->  U[-3, -1)
    log_sigma = jax.random.uniform(k1, (1,), dtype=jnp.float32) * 2.0 - 3.0
    # torch.rand(M, z_dim) * 2 - 1 ->  U[-1, 1); sampled directly in (z_dim, M)
    # layout so no HBM transpose round-trip is needed before the kernel.
    e_t = jax.random.uniform(k2, (z_dim, M), dtype=jnp.float32) * 2.0 - 1.0
    return log_sigma, e_t


def latent_layer_forward(data, *, M, key, tile_n=None, tile_m=None):
    """Pallas equivalent of LatentLayer.forward (randomness sampled with `key`)."""
    z = data["z"]
    N, z_dim = z.shape

    log_sigma, e_t = _sample_randomness(key, M, z_dim)       # (1,), (z_dim, M)
    alpha = -0.5 * jnp.exp(-2.0 * log_sigma)                 # -1/(2*sigma^2), (1,)

    # --- pad to MXU / vreg friendly shapes -------------------------------------
    d_pad = _round_up(max(z_dim, 1), 128)       # contraction dim -> full MXU depth
    tn = tile_n if tile_n is not None else min(256, _round_up(N, 8))
    tn = _round_up(tn, 8)
    n_pad = _round_up(N, tn)
    tm = tile_m if tile_m is not None else min(512, _round_up(M, 128))
    tm = _round_up(tm, 128)
    m_pad = _round_up(M, tm)

    z_p = jnp.pad(z, ((0, n_pad - N), (0, d_pad - z_dim)))
    e_t_p = jnp.pad(e_t, ((0, d_pad - z_dim), (0, m_pad - M)))

    grid = (m_pad // tm, n_pad // tn)           # (parallel M tiles, N reduction)
    kernel = functools.partial(_lse_latent_kernel, n_valid=N)

    z_tanh_p, lse_cols = pl.pallas_call(
        kernel,
        out_shape=(
            jax.ShapeDtypeStruct((n_pad, d_pad), z.dtype),   # tanh(z), lane-dense
            jax.ShapeDtypeStruct((1, m_pad), jnp.float32),   # per-column logsumexp
        ),
        grid_spec=pltpu.PrefetchScalarGridSpec(
            num_scalar_prefetch=0,
            grid=grid,
            in_specs=[
                pl.BlockSpec(memory_space=pltpu.MemorySpace.SMEM),     # alpha (1,)
                pl.BlockSpec((tn, d_pad), lambda m, n: (n, 0)),        # z tile
                pl.BlockSpec((d_pad, tm), lambda m, n: (0, m)),        # e^T tile (resident over n)
            ],
            out_specs=(
                pl.BlockSpec((tn, d_pad), lambda m, n: (n, 0)),        # tanh(z)
                pl.BlockSpec((1, tm), lambda m, n: (0, m)),            # LSE columns
            ),
            scratch_shapes=[
                pltpu.VMEM((1, tm), jnp.float32),   # alpha * ||e||^2 (per m tile)
                pltpu.VMEM((1, tm), jnp.float32),   # running max
                pltpu.VMEM((1, tm), jnp.float32),   # running sum(exp)
            ],
        ),
        compiler_params=pltpu.CompilerParams(
            dimension_semantics=("parallel", "arbitrary"),
            # tiles budgeted at a few MiB -> comfortably under 32 MiB scoped VMEM
            # on all of v5e / v6e / v7x (v7x physical is only 64 MiB).
            vmem_limit_bytes=32 * 1024 * 1024,
        ),
    )(alpha, z_p, e_t_p)

    # tiny scalar epilogue in plain JAX (keeps the M grid axis megacore-safe)
    mean_lse = jnp.sum(lse_cols[0, :M]) / M
    # np.log(np.e) == 1.0
    loss = -mean_lse + 0.5 * z_dim * (2.0 * log_sigma - 1.0) + jnp.log(jnp.float32(N))

    out = dict(data)
    out["z"] = z_tanh_p[:N, :z_dim]
    out["lse_loss"] = loss.reshape((1,))
    return out


def _reference_forward(z, e, log_sigma):
    """Pure-JAX reference matching the PyTorch code."""
    th = jnp.tanh(z)
    N, z_dim = th.shape
    dist = jnp.sum((th[:, None, :] - e[None, :, :]) ** 2, axis=2)  # (N, M)
    alpha = -1.0 / (2.0 * jnp.exp(log_sigma[0]) ** 2)
    lse = jax.scipy.special.logsumexp(alpha * dist, axis=0)        # (M,)
    loss = (-jnp.mean(lse) + 0.5 * z_dim * (2.0 * log_sigma[0] - 1.0)
            + jnp.log(float(N)))
    return th, loss


if __name__ == "__main__":
    key = jax.random.PRNGKey(0)
    k_z, k_rand = jax.random.split(key)

    # Small shapes; tile overrides force a real (2, 3) grid with both row
    # (N-reduction) padding/masking and column (M) padding exercised.
    N, z_dim, M = 20, 32, 200
    z = jax.random.normal(k_z, (N, z_dim), dtype=jnp.float32)
    data = {"z": z}

    out = latent_layer_forward(data, M=M, key=k_rand, tile_n=8, tile_m=128)
    jax.block_until_ready(out["z"])
    jax.block_until_ready(out["lse_loss"])

    # sanity-check against a pure-JAX reference using the same sampled randoms
    log_sigma, e_t = _sample_randomness(k_rand, M, z_dim)
    th_ref, loss_ref = _reference_forward(z, e_t.T, log_sigma)

    assert out["z"].shape == (N, z_dim)
    assert out["lse_loss"].shape == (1,)
    assert jnp.allclose(out["z"], th_ref, atol=1e-5, rtol=1e-5)
    assert jnp.allclose(out["lse_loss"][0], loss_ref, atol=1e-2, rtol=1e-3)

    print("KERNEL_OK")
</pallas_src>

<mosaic_0001>
module attributes {stable_mosaic.version = 11 : i64} {
  func.func @_lse_latent_kernel(%arg0: i32, %arg1: i32, %arg2: memref<1xf32, #tpu.memory_space<smem>>, %arg3: memref<8x128xf32, #tpu.memory_space<vmem>>, %arg4: memref<128x128xf32, #tpu.memory_space<vmem>>, %arg5: memref<8x128xf32, #tpu.memory_space<vmem>>, %arg6: memref<1x128xf32, #tpu.memory_space<vmem>>, %arg7: memref<1x128xf32, #tpu.memory_space<vmem>>, %arg8: memref<1x128xf32, #tpu.memory_space<vmem>>, %arg9: memref<1x128xf32, #tpu.memory_space<vmem>>) attributes {dimension_semantics = [#tpu.dimension_semantics<parallel>, #tpu.dimension_semantics<arbitrary>], iteration_bounds = array<i64: 2, 3>, scalar_prefetch = 0 : i64, scratch_operands = 3 : i64, tpu.core_type = #tpu.core_type<tc>, window_params = [{transform_indices = @transform_0, window_bounds = array<i64: 1>}, {transform_indices = @transform_1, window_bounds = array<i64: 8, 128>}, {transform_indices = @transform_2, window_bounds = array<i64: 128, 128>}, {transform_indices = @transform_3, window_bounds = array<i64: 8, 128>}, {transform_indices = @transform_4, window_bounds = array<i64: 1, 128>}]} {
    %c0 = arith.constant 0 : index
    %0 = memref.load %arg2[%c0] : memref<1xf32, #tpu.memory_space<smem>>
    %c0_0 = arith.constant 0 : index
    %c0_1 = arith.constant 0 : index
    %1 = vector.load %arg3[%c0_0, %c0_1] : memref<8x128xf32, #tpu.memory_space<vmem>>, vector<8x128xf32>
    %2 = math.tanh %1 : vector<8x128xf32>
    %c0_2 = arith.constant 0 : index
    %c0_3 = arith.constant 0 : index
    %3 = vector.load %arg5[%c0_2, %c0_3] : memref<8x128xf32, #tpu.memory_space<vmem>>, vector<8x128xf32>
    tpu.vector_store %arg5[%c0_2, %c0_3], %2 {strides = array<i32>} : memref<8x128xf32, #tpu.memory_space<vmem>>, vector<8x128xf32>,
    %c0_i32 = arith.constant 0 : i32
    %4 = arith.cmpi eq, %arg1, %c0_i32 : i32
    %5 = arith.extui %4 : i1 to i32
    %c0_i32_4 = arith.constant 0 : i32
    %6 = arith.cmpi ne, %5, %c0_i32_4 : i32
    scf.if %6 {
      %c0_26 = arith.constant 0 : index
      %c0_27 = arith.constant 0 : index
      %52 = vector.load %arg4[%c0_26, %c0_27] : memref<128x128xf32, #tpu.memory_space<vmem>>, vector<128x128xf32>
      %53 = arith.mulf %52, %52 : vector<128x128xf32>
      %cst_28 = arith.constant dense<0.000000e+00> : vector<128xf32>
      %54 = vector.multi_reduction <add>, %53, %cst_28 [0] : vector<128x128xf32> to vector<128xf32>
      %55 = vector.shape_cast %54 : vector<128xf32> to vector<1x128xf32>
      %56 = vector.broadcast %0 : f32 to vector<1x128xf32>
      %57 = arith.mulf %56, %55 : vector<1x128xf32>
      %c0_29 = arith.constant 0 : index
      %c0_30 = arith.constant 0 : index
      %58 = vector.load %arg7[%c0_29, %c0_30] : memref<1x128xf32, #tpu.memory_space<vmem>>, vector<1x128xf32>
      tpu.vector_store %arg7[%c0_29, %c0_30], %57 {strides = array<i32>} : memref<1x128xf32, #tpu.memory_space<vmem>>, vector<1x128xf32>,
      %cst_31 = arith.constant -1.000000e+30 : f32
      %59 = vector.broadcast %cst_31 : f32 to vector<1x128xf32>
      %c0_32 = arith.constant 0 : index
      %c0_33 = arith.constant 0 : index
      %60 = vector.load %arg8[%c0_32, %c0_33] : memref<1x128xf32, #tpu.memory_space<vmem>>, vector<1x128xf32>
      tpu.vector_store %arg8[%c0_32, %c0_33], %59 {strides = array<i32>} : memref<1x128xf32, #tpu.memory_space<vmem>>, vector<1x128xf32>,
      %cst_34 = arith.constant 0.000000e+00 : f32
      %61 = vector.broadcast %cst_34 : f32 to vector<1x128xf32>
      %c0_35 = arith.constant 0 : index
      %c0_36 = arith.constant 0 : index
      %62 = vector.load %arg9[%c0_35, %c0_36] : memref<1x128xf32, #tpu.memory_space<vmem>>, vector<1x128xf32>
      tpu.vector_store %arg9[%c0_35, %c0_36], %61 {strides = array<i32>} : memref<1x128xf32, #tpu.memory_space<vmem>>, vector<1x128xf32>,
    } else {
    }
    %cst = arith.constant -2.000000e+00 : f32
    %7 = arith.mulf %cst, %0 : f32
    %8 = vector.broadcast %7 : f32 to vector<8x128xf32>
    %9 = arith.mulf %2, %8 : vector<8x128xf32>
    %c0_5 = arith.constant 0 : index
    %c0_6 = arith.constant 0 : index
    %10 = vector.load %arg4[%c0_5, %c0_6] : memref<128x128xf32, #tpu.memory_space<vmem>>, vector<128x128xf32>
    %cst_7 = arith.constant dense<0.000000e+00> : vector<8x128xf32>
    %11 = tpu.matmul %9, %10, %cst_7 {dimension_numbers = #tpu.dot_dimension_numbers<[1], [0], [0], [1], [0, 0, 1, 1], [], []>} : vector<8x128xf32>, vector<128x128xf32>, vector<8x128xf32> -> vector<8x128xf32>
    %12 = arith.mulf %2, %2 : vector<8x128xf32>
    %cst_8 = arith.constant dense<0.000000e+00> : vector<8xf32>
    %13 = vector.multi_reduction <add>, %12, %cst_8 [1] : vector<8x128xf32> to vector<8xf32>
    %14 = vector.shape_cast %13 : vector<8xf32> to vector<8x1xf32>
    %c8_i32 = arith.constant 8 : i32
    %15 = arith.muli %arg1, %c8_i32 : i32
    %16 = tpu.iota {dimensions = array<i32: 0>} : vector<8x1xi32>
    %17 = vector.broadcast %15 : i32 to vector<8x1xi32>
    %18 = arith.addi %17, %16 : vector<8x1xi32>
    %19 = vector.broadcast %0 : f32 to vector<8x1xf32>
    %20 = arith.mulf %19, %14 : vector<8x1xf32>
    %c20_i32 = arith.constant 20 : i32
    %21 = vector.broadcast %c20_i32 : i32 to vector<8x1xi32>
    %22 = arith.cmpi slt, %18, %21 : vector<8x1xi32>
    %cst_9 = arith.constant 0.000000e+00 : f32
    %cst_10 = arith.constant -1.000000e+30 : f32
    %23 = vector.broadcast %cst_9 : f32 to vector<8x1xf32>
    %24 = vector.broadcast %cst_10 : f32 to vector<8x1xf32>
    %25 = arith.select %22, %23, %24 : vector<8x1xi1>, vector<8x1xf32>
    %26 = arith.addf %20, %25 : vector<8x1xf32>
    %27 = vector.broadcast %26 : vector<8x1xf32> to vector<8x128xf32>
    %28 = arith.addf %11, %27 : vector<8x128xf32>
    %c0_11 = arith.constant 0 : index
    %c0_12 = arith.constant 0 : index
    %29 = vector.load %arg7[%c0_11, %c0_12] : memref<1x128xf32, #tpu.memory_space<vmem>>, vector<1x128xf32>
    %30 = vector.broadcast %29 : vector<1x128xf32> to vector<8x128xf32>
    %31 = arith.addf %28, %30 : vector<8x128xf32>
    %cst_13 = arith.constant dense<0xFF800000> : vector<128xf32>
    %32 = vector.multi_reduction <maximumf>, %31, %cst_13 [0] : vector<8x128xf32> to vector<128xf32>
    %33 = vector.shape_cast %32 : vector<128xf32> to vector<1x128xf32>
    %c0_14 = arith.constant 0 : index
    %c0_15 = arith.constant 0 : index
    %34 = vector.load %arg8[%c0_14, %c0_15] : memref<1x128xf32, #tpu.memory_space<vmem>>, vector<1x128xf32>
    %35 = arith.maximumf %34, %33 : vector<1x128xf32>
    %c0_16 = arith.constant 0 : index
    %c0_17 = arith.constant 0 : index
    %36 = vector.load %arg9[%c0_16, %c0_17] : memref<1x128xf32, #tpu.memory_space<vmem>>, vector<1x128xf32>
    %c0_18 = arith.constant 0 : index
    %c0_19 = arith.constant 0 : index
    %37 = vector.load %arg8[%c0_18, %c0_19] : memref<1x128xf32, #tpu.memory_space<vmem>>, vector<1x128xf32>
    %38 = arith.subf %37, %35 : vector<1x128xf32>
    %39 = math.exp %38 : vector<1x128xf32>
    %40 = arith.mulf %36, %39 : vector<1x128xf32>
    %41 = vector.broadcast %35 : vector<1x128xf32> to vector<8x128xf32>
    %42 = arith.subf %31, %41 : vector<8x128xf32>
    %43 = math.exp %42 : vector<8x128xf32>
    %cst_20 = arith.constant dense<0.000000e+00> : vector<128xf32>
    %44 = vector.multi_reduction <add>, %43, %cst_20 [0] : vector<8x128xf32> to vector<128xf32>
    %45 = vector.shape_cast %44 : vector<128xf32> to vector<1x128xf32>
    %46 = arith.addf %40, %45 : vector<1x128xf32>
    %c0_21 = arith.constant 0 : index
    %c0_22 = arith.constant 0 : index
    %47 = vector.load %arg9[%c0_21, %c0_22] : memref<1x128xf32, #tpu.memory_space<vmem>>, vector<1x128xf32>
    tpu.vector_store %arg9[%c0_21, %c0_22], %46 {strides = array<i32>} : memref<1x128xf32, #tpu.memory_space<vmem>>, vector<1x128xf32>,
    %c0_23 = arith.constant 0 : index
    %c0_24 = arith.constant 0 : index
    %48 = vector.load %arg8[%c0_23, %c0_24] : memref<1x128xf32, #tpu.memory_space<vmem>>, vector<1x128xf32>
    tpu.vector_store %arg8[%c0_23, %c0_24], %35 {strides = array<i32>} : memref<1x128xf32, #tpu.memory_space<vmem>>, vector<1x128xf32>,
    %c2_i32 = arith.constant 2 : i32
    %49 = arith.cmpi eq, %arg1, %c2_i32 : i32
    %50 = arith.extui %49 : i1 to i32
    %c0_i32_25 = arith.constant 0 : i32
    %51 = arith.cmpi ne, %50, %c0_i32_25 : i32
    scf.if %51 {
      %c0_26 = arith.constant 0 : index
      %c0_27 = arith.constant 0 : index
      %52 = vector.load %arg8[%c0_26, %c0_27] : memref<1x128xf32, #tpu.memory_space<vmem>>, vector<1x128xf32>
      %c0_28 = arith.constant 0 : index
      %c0_29 = arith.constant 0 : index
      %53 = vector.load %arg9[%c0_28, %c0_29] : memref<1x128xf32, #tpu.memory_space<vmem>>, vector<1x128xf32>
      %54 = math.log %53 : vector<1x128xf32>
      %55 = arith.addf %52, %54 : vector<1x128xf32>
      %c0_30 = arith.constant 0 : index
      %c0_31 = arith.constant 0 : index
      %56 = vector.load %arg6[%c0_30, %c0_31] : memref<1x128xf32, #tpu.memory_space<vmem>>, vector<1x128xf32>
      tpu.vector_store %arg6[%c0_30, %c0_31], %55 {strides = array<i32>} : memref<1x128xf32, #tpu.memory_space<vmem>>, vector<1x128xf32>,
    } else {
    }
    return
  }
  func.func @transform_0(%arg0: i32, %arg1: i32) -> i32 {
    %c0_i32 = arith.constant 0 : i32
    %c0_i32_0 = arith.constant 0 : i32
    return %c0_i32 : i32
  }
  func.func @transform_1(%arg0: i32, %arg1: i32) -> (i32, i32) {
    %c0_i32 = arith.constant 0 : i32
    %c0_i32_0 = arith.constant 0 : i32
    return %arg1, %c0_i32 : i32, i32
  }
  func.func @transform_2(%arg0: i32, %arg1: i32) -> (i32, i32) {
    %c0_i32 = arith.constant 0 : i32
    %c0_i32_0 = arith.constant 0 : i32
    return %c0_i32, %arg0 : i32, i32
  }
  func.func @transform_3(%arg0: i32, %arg1: i32) -> (i32, i32) {
    %c0_i32 = arith.constant 0 : i32
    %c0_i32_0 = arith.constant 0 : i32
    return %arg1, %c0_i32 : i32, i32
  }
  func.func @transform_4(%arg0: i32, %arg1: i32) -> (i32, i32) {
    %c0_i32 = arith.constant 0 : i32
    %c0_i32_0 = arith.constant 0 : i32
    return %c0_i32, %arg0 : i32, i32
  }
}

</mosaic_0001>

<bundles_post_ra>
// kernel: tpu_custom_call.1
= control target key start
LH: loop header
LB: loop body
LE: loop exit
PB: predicated region body
PF: predicated region fallthrough
CT: control target
= control target key end

     0   :  { %s1536_s0 = inlined_call_operand.<no memory space> [shape: f32[1], index: 0, kind: input, shape index: {}]   ;;  %s1537_s1 = inlined_call_operand.hbm [shape: f32[24,128], index: 1, kind: input, shape index: {}]   ;;  %s1538_s2 = inlined_call_operand.hbm [shape: f32[128,256], index: 2, kind: input, shape index: {}]   ;;  %s1539_s3 = inlined_call_operand.hbm [shape: f32[24,128], index: 3, kind: output, shape index: {0}]   ;;  %s1540_s4 = inlined_call_operand.hbm [shape: f32[1,256], index: 4, kind: output, shape index: {1}]  }
   0x1   :  { %1550 = sst [smem:[#allocation25_spill]] %s1537_s1 }
   0x2   :  { %10 = sst [smem:[#allocation5]] %s1536_s0 }
   0x3   :  { %11 = vsyncpa [#allocation7], 0 }
   0x4   :  { %13 = vsyncpa [#allocation7 + $0x1], 0 }
   0x5   :  { %14 = vsyncpa [#allocation10], 0 }
   0x6   :  { %16 = vsyncpa [#allocation10 + $0x1], 0 }
   0x7   :  { %17 = vsyncpa [#allocation8], 0 }
   0x8   :  { %19 = vsyncpa [#allocation8 + $0x1], 0 }
   0x9   :  { %20 = vsyncpa [#allocation13], 0 }
   0xa   :  { %22 = vsyncpa [#allocation13 + $0x1], 0  ;;  %s1142_s17 = smov 0   ;;  %s1144_s18 = smov 0  }
   0xb   :  { %s1146_s19 = smov 0   ;;  %s1148_s20 = smov 0  }
   0xc   :  { %s1150_s21 = smov 0   ;;  %s1152_s22 = smov 0  }
   0xd   :  { %s1154_s0 = smov 0   ;;  %s1156_s23 = smov 0  }
   0xe   :  { %s1158_s24 = smov 0   ;;  %s1160_s25 = smov 0  }
   0xf   :  { %s1162_s26 = smov 0  }
  0x10 LB: > { %1551 = sst [smem:[#allocation18_spill]] %s1059_s17  ;;  %s655_s27 = sadd.s32 4294967295, %s1099_s26   ;;  %s1099_s26 = sphi %s1162_s26, %s28_s26   ;;  %s1095_s25 = sphi %s1160_s25, %s1583_s25   ;;  %s1091_s24 = sphi %s1158_s24, %s1582_s24   ;;  %s1087_s23 = sphi %s1156_s23, %s1581_s23   ;;  %s1083_s0 = sphi %s1154_s0, %s1580_s0   ;;  %s1079_s22 = sphi %s1152_s22, %s1589_s22   ;;  %s1075_s21 = sphi %s1150_s21, %s1588_s21   ;;  %s1071_s20 = sphi %s1148_s20, %s1587_s20   ;;  %s1067_s19 = sphi %s1146_s19, %s1586_s19   ;;  %s1063_s18 = sphi %s1144_s18, %s1585_s18   ;;  %s1059_s17 = sphi %s1142_s17, %s1584_s17  }
  0x11   : > { %1552 = sst [smem:[#allocation19_spill]] %s1091_s24  ;;  %s656_s28 = sadd.s32 4294967294, %s1099_s26  }
  0x12   : > { %1553 = sst [smem:[#allocation20_spill]] %s1095_s25  ;;  %s37_s29 = sadd.s32 1, %s1091_s24 }
  0x13   : > { %s40_s30 = sadd.s32 1, %s1095_s25  ;;  %p38_p0 = scmp.ge.s32.totalorder %s37_s29, 3 }
  0x14   : > { %s68_s5 = sadd.s32 1, %s1079_s22  ;;  %p75_p1 = scmp.ne.s32.totalorder %s1079_s22, %s1075_s21 }
  0x15   : > { %p76_p2 = scmp.eq.s32.totalorder %s1099_s26, 0  ;;  %s1591_s29 = smov (%p38_p0, %s37_s29), 0 }
  0x16   : > { %1554 = sst [smem:[#allocation21_spill]] %s1591_s29  ;;  %s1593_s30 = smov (!%p38_p0, %s40_s30), %s1095_s25 }
  0x17   : > { %s65_s6 = ssub.s32 %s1091_s24, %s1591_s29  ;;  %p1215_p3 = por %p76_p2, %p75_p1 }
  0x18   : > { %p42_p4 = scmp.ge.s32.totalorder %s1593_s30, 2  ;;  %p66_p5 = scmp.eq.s32.totalorder %s65_s6, 0 }
  0x19   : > { %p81_p6 = scmp.ne.s32.totalorder %s1075_s21, %s1071_s20  ;;  %p82_p7 = scmp.eq.s32.totalorder %s655_s27, 0 }
  0x1a   : > { %s1595_s30 = smov (%p42_p4, %s1593_s30), 0  ;;  %s94_s11 = sadd.s32 1, %s1067_s19 }
  0x1b   : > { %1556 = sst [smem:[#allocation22_spill]] %s1595_s30  ;;  %p1229_p8 = por %p82_p7, %p81_p6 }
  0x1c   : > { %s1224_s8 = scalar_select %p66_p5, %s1079_s22, %s68_s5  }
  0x1d   : > { %s1558_s9 = scalar_select %p1229_p8, 1, 0 }
  0x1e   : > { %1557 = sst [smem:[#allocation23_spill]] %s1224_s8  ;;  %s91_s10 = ssub.s32 %s1095_s25, %s1595_s30 }
  0x1f   : > { %p92_p9 = scmp.eq.s32.totalorder %s91_s10, 0  ;;  %p101_p10 = scmp.ne.s32.totalorder %s1067_s19, %s1063_s18 }
  0x20   : > { %p107_p11 = scmp.ne.s32.totalorder %s1063_s18, %s1059_s17  ;;  %p131_p0 = scmp.eq.s32.totalorder %s655_s27, 5 }
  0x21   : > { %s1241_s12 = scalar_select %p92_p9, %s1067_s19, %s94_s11  }
  0x22   : > { %p1245_p12 = por %p101_p10, %p76_p2  ;;  %p1249_p13 = por %p107_p11, %p82_p7 }
  0x23   : > { %1559 = sst [smem:[#allocation24_spill]] %s1241_s12  ;;  %p137_p4 = scmp.eq.s32.totalorder %s656_s28, 5 }
  0x24   : > { %s1561_s14 = scalar_select %p1249_p13, 1, 0 }
  0x25   : > { %p774_p5 = scmp.lt.s32.totalorder %s1099_s26, 6  ;;  %p1257_p9 = por %p131_p0, %p75_p1 }
  0x26   : > { %p1264_p2 = por %p137_p4, %p81_p6  ;;  %p1268_p7 = por %p131_p0, %p101_p10 }
  0x27   : > { %s1562_s15 = scalar_select %p1257_p9, 1, 0 }
  0x28   : > { %s1563_s16 = scalar_select %p1264_p2, 1, 0 }
  0x29   : > { %s1564_s5 = scalar_select %p1268_p7, 1, 0 }
  0x2a   : > { %p1272_p13 = por %p137_p4, %p107_p11  ;;  %s186_s27 = sand.u32 1, %s1079_s22  }
  0x2b   : > { %s660_s28 = sshll.u32 %s1091_s24, 7  ;;  %s659_s10 = sshll.u32 %s186_s27, 3 }
  0x2c   : > { %s1565_s6 = scalar_select %p1272_p13, 1, 0 }
  0x2d   : > { %s1566_s1 = sld [smem:[#allocation25_spill]]  ;;  %s190_s8 = scalar_lea.vmem [#allocation6], %s659_s10 }
  0x2e   : > { %s197_s12 = sshll.u32 %s190_s8, 4  ;;  %p1287_p1 = pnand %p774_p5, %p1215_p3  ;;  %s1291_s12 = int_to_ptr.vmem [resolvable:$true] %s197_s12 }
  0x2f   : > { %p1297_p6 = pnand %p774_p5, %p1245_p12 }
  0x30   : > { %p883_p0 = pneg %p1287_p1 }
  0x33   : > { %s1281_s29 = scalar_lea.hbm %s1566_s1, %s660_s28  ;;  %s187_s28 = scalar_lea.sflag [#allocation7], %s186_s27 }
  0x34   : > { %s881_s10 = scalar_lea.hbm %s1281_s29, 128  ;;  %s886_s11 = scalar_lea.hbm %s1566_s1, 384 }
  0x35   : > { %p882_p11 = scmp.ne.s32.totalorder %s1281_s29, %s881_s10  ;;  %p887_p12 = scmp.lt.u32.totalorder %s1281_s29, %s1566_s1 }
  0x36   : > { %p888_p5 = scmp.lt.u32.totalorder %s886_s11, %s881_s10  ;;  %p890_p10 = scmp.lt.u32.totalorder %s881_s10, %s1281_s29 }
  0x37   : > { %p884_p3 = pnand %p883_p0, %p882_p11 }
  0x38   : > { %p889_p13 = por %p888_p5, %p887_p12 }
  0x39   : > { %p885_p4 = pneg %p884_p3 }
  0x3a   : > { %p891_p2 = por %p890_p10, %p889_p13 }
  0x3c   : > { %p892_p7 = pnand %p891_p2, %p885_p4 }
  0x3e   : > { %895 = shalt.err (!%p892_p7)
}
  0x3f   : > { %s896_s27 = scalar_lea.vmem %s1291_s12, 128  ;;  %s1101_s7 = smov [#allocation6]  }
  0x40   : > { %p897_p11 = scmp.ne.s32.totalorder %s1291_s12, %s896_s27  ;;  %s901_s8 = sshll.u32 %s1101_s7, 4  ;;  %s902_s8 = int_to_ptr.vmem [resolvable:$false] %s901_s8 }
  0x41   : > { %s903_s24 = scalar_lea.vmem %s902_s8, 256  ;;  %p904_p8 = scmp.lt.s32.totalorder %s1291_s12, %s902_s8 }
  0x42   : > { %p899_p3 = pnand %p897_p11, %p883_p0  ;;  %p905_p12 = scmp.lt.s32.totalorder %s903_s24, %s896_s27 }
  0x44   : > { %p900_p9 = pneg %p899_p3  ;;  %p906_p5 = por %p905_p12, %p904_p8 }
  0x46   : > { %p907_p13 = pnand %p906_p5, %p900_p9 }
  0x48   : > { %910 = shalt.err (!%p907_p13)
}
  0x49   : > { %763 = dma.hbm_to_vmem [thread:$0]  (!%p1287_p1), %s1281_s29, 128, %s1291_s12, %s187_s28  }
  0x4a   : > { %p222_p2 = scmp.lt.s32.totalorder %s1099_s26, 7  ;;  %s204_s10 = sand.u32 1, %s1067_s19  }
  0x4b   : > { %s662_s11 = sshll.u32 %s1095_s25, 7  ;;  %p1569_p7 = scmp.ge.s32.totalorder %s1099_s26, 1 }
  0x4c   : > { %s661_s27 = sshll.u32 %s204_s10, 7  ;;  %s1339_s8 = scalar_lea.hbm %s1538_s2, %s662_s11 }
  0x4d   : > { %p1332_p10 = pnand %p1569_p7, %p222_p2  ;;  %s208_s24 = scalar_lea.vmem [#allocation9], %s661_s27 }
  0x4e   : > { %s214_s29 = sshll.u32 %s208_s24, 4  ;;  %s1343_s12 = scalar_lea.sflag [#allocation10], %s204_s10  ;;  %s1341_s29 = int_to_ptr.vmem [resolvable:$true] %s214_s29 }
  0x4f   : > { %s911_s28 = scalar_lea.hbm %s1339_s8, 2048  ;;  %p913_p9 = pneg %p1297_p6 }
  0x50   : > { %p912_p8 = scmp.ne.s32.totalorder %s1339_s8, %s911_s28  ;;  %s916_s17 = scalar_lea.hbm %s1538_s2, 4096 }
  0x51   : > { %p917_p4 = scmp.lt.u32.totalorder %s1339_s8, %s1538_s2  ;;  %p918_p11 = scmp.lt.u32.totalorder %s916_s17, %s911_s28 }
  0x52   : > { %p914_p1 = pnand %p913_p9, %p912_p8  ;;  %p920_p12 = scmp.lt.u32.totalorder %s911_s28, %s1339_s8 }
  0x53   : > { %p919_p3 = por %p918_p11, %p917_p4 }
  0x54   : > { %p915_p0 = pneg %p914_p1 }
  0x55   : > { %p921_p5 = por %p920_p12, %p919_p3 }
  0x57   : > { %p922_p13 = pnand %p921_p5, %p915_p0 }
  0x59   : > { %925 = shalt.err (!%p922_p13)
}
  0x5a   : > { %s926_s10 = scalar_lea.vmem %s1341_s29, 2048  ;;  %s1102_s27 = smov [#allocation9]  }
  0x5b   : > { %p927_p2 = scmp.ne.s32.totalorder %s1341_s29, %s926_s10  ;;  %s931_s24 = sshll.u32 %s1102_s27, 4  ;;  %s932_s24 = int_to_ptr.vmem [resolvable:$false] %s931_s24 }
  0x5c   : > { %s933_s1 = scalar_lea.vmem %s932_s24, 4096  ;;  %p934_p1 = scmp.lt.s32.totalorder %s1341_s29, %s932_s24 }
  0x5d   : > { %p929_p7 = pnand %p927_p2, %p913_p9  ;;  %p935_p4 = scmp.lt.s32.totalorder %s933_s1, %s926_s10 }
  0x5f   : > { %p930_p8 = pneg %p929_p7  ;;  %p936_p11 = por %p935_p4, %p934_p1 }
  0x61   : > { %p937_p3 = pnand %p936_p11, %p930_p8 }
  0x63   : > { %940 = shalt.err (!%p937_p3)
}
  0x64   : > { %s1103_s25 = smov 256   ;;  %s1104_s28 = smov 128  }
  0x65   : > { %s1105_s11 = smov 8   ;;  %226 = sbr.rel (%p1332_p10) target bundleno = 532 (0x214), region = 32 }
  0x66   : > { %766 = dma.hbm_to_vmem [thread:$0]  (!%p1297_p6), %s1339_s8, 2048, %s1341_s29, %s1343_s12, %s1103_s25, %s1104_s28, %s1105_s11  }
  0x67   : > { %s1374_s7 = sand.u32 (!%p1332_p10), 1, %s1075_s21   ;;  %p1571_p9 = scmp.ne.s32.totalorder (!%p1332_p10), %s1558_s9, 0 }
  0x68   : > { %s664_s17 = sshll.u32 (!%p1332_p10), %s1374_s7, 3  ;;  %s229_s10 = scalar_lea.sflag (!%p1332_p10), [#allocation7], %s1374_s7 }
  0x69   : > { %s232_s27 = scalar_lea.vmem (!%p1332_p10), [#allocation6], %s664_s17 }
  0x6c   : > { %1042 = dma.done.wait (%p1571_p9), %s229_s10, 128  }
  0x6d   : > { %1044 = vsyncadd (%p1571_p9), %s229_s10, 4294967168  ;;  %s1383_s30 = sand.u32 1, %s1063_s18   ;;  %p1572_p6 = scmp.ne.s32.totalorder %s1561_s14, 0 }
  0x6e   : > { %s665_s13 = sshll.u32 %s1383_s30, 7  ;;  %s238_s8 = scalar_lea.sflag [#allocation10], %s1383_s30 }
  0x6f   : > { %s1387_s29 = scalar_lea.vmem [#allocation9], %s665_s13 }
  0x70   : > { %1046 = dma.done.wait (%p1572_p6), %s238_s8, 2048  }
  0x71   : > { %1048 = vsyncadd (%p1572_p6), %s238_s8, 4294965248  ;;  %s1393_s12 = sld [smem:[#allocation5]]  ;;  %v276_v0 = vld [vmem:[%s232_s27] sm:$0xff]  ;;  %s1397_s9 = scalar_lea.vmem [#allocation11], %s664_s17 }
  0x72   : > { %873 = vtanh.f32 %v276_v0  ;;  %s274_s24 = scalar_lea.vmem [#allocation12], %s1383_s30  ;;  %p667_p10 = scmp.ne.s32.totalorder %s1083_s0, 0 }
  0x73   : > { %v283_v2 = vld [vmem:[%s1387_s29] sm:$0xff] (!%p667_p10)  ;;  %v284_v3 = vld [vmem:[%s1387_s29 + $0x8] sm:$0xff] (!%p667_p10)  ;;  %v285_v4 = vld [vmem:[%s1387_s29 + $0x10] sm:$0xff] (!%p667_p10)  ;;  %v1106_v9 = vmov (!%p667_p10), -1e+30   ;;  %v1107_v10 = vmov (!%p667_p10), 0.0  }
  0x74   : > { %v286_v5 = vld [vmem:[%s1387_s29 + $0x18] sm:$0xff] (!%p667_p10)  ;;  %v299_v6 = vmul.f32 (!%p667_p10), %v283_v2, %v283_v2  ;;  %v300_v7 = vmul.f32 (!%p667_p10), %v284_v3, %v284_v3  ;;  %v301_v8 = vmul.f32 (!%p667_p10), %v285_v4, %v285_v4  ;;  %339 = vst [vmem:[#allocation3] sm:$0x1] (!%p667_p10), %v1106_v9  ;;  %340 = vst [vmem:[#allocation4] sm:$0x1] (!%p667_p10), %v1107_v10  ;;  %v287_v11 = vld [vmem:[%s1387_s29 + $0x20] sm:$0xff] (!%p667_p10) }
  0x75   : > { %v302_v12 = vmul.f32 (!%p667_p10), %v286_v5, %v286_v5  ;;  %v288_v14 = vld [vmem:[%s1387_s29 + $0x28] sm:$0xff] (!%p667_p10)  ;;  %v303_v15 = vmul.f32 (!%p667_p10), %v287_v11, %v287_v11  ;;  %v289_v17 = vld [vmem:[%s1387_s29 + $0x30] sm:$0xff] (!%p667_p10)  ;;  %v290_v20 = vld [vmem:[%s1387_s29 + $0x38] sm:$0xff] (!%p667_p10) }
  0x76   : > { %v315_v13 = vadd.f32 (!%p667_p10), %v300_v7, %v299_v6  ;;  %v304_v18 = vmul.f32 (!%p667_p10), %v288_v14, %v288_v14  ;;  %v305_v21 = vmul.f32 (!%p667_p10), %v289_v17, %v289_v17  ;;  %v291_v23 = vld [vmem:[%s1387_s29 + $0x40] sm:$0xff] (!%p667_p10)  ;;  %v306_v24 = vmul.f32 (!%p667_p10), %v290_v20, %v290_v20  ;;  %v292_v26 = vld [vmem:[%s1387_s29 + $0x48] sm:$0xff] (!%p667_p10)  ;;  %v293_v29 = vld [vmem:[%s1387_s29 + $0x50] sm:$0xff] (!%p667_p10) }
  0x77   : > { %282 = sbr.rel (%p667_p10) target bundleno = 163 (0xa3), region = 44  ;;  %v307_v27 = vmul.f32 (!%p667_p10), %v291_v23, %v291_v23  ;;  %v308_v30 = vmul.f32 (!%p667_p10), %v292_v26, %v292_v26  ;;  %v294_v32 = vld [vmem:[%s1387_s29 + $0x58] sm:$0xff] (!%p667_p10)  ;;  %v309_v33 = vmul.f32 (!%p667_p10), %v293_v29, %v293_v29  ;;  %v295_v35 = vld [vmem:[%s1387_s29 + $0x60] sm:$0xff] (!%p667_p10)  ;;  %v296_v38 = vld [vmem:[%s1387_s29 + $0x68] sm:$0xff] (!%p667_p10)  ;;  %v336_v56 = vstv (!%p667_p10), %s1393_s12 }
  0x78   : > { %v316_v16 = vadd.f32 (!%p667_p10), %v315_v13, %v301_v8  ;;  %v310_v36 = vmul.f32 (!%p667_p10), %v294_v32, %v294_v32  ;;  %v311_v39 = vmul.f32 (!%p667_p10), %v295_v35, %v295_v35  ;;  %v297_v41 = vld [vmem:[%s1387_s29 + $0x70] sm:$0xff] (!%p667_p10)  ;;  %v312_v42 = vmul.f32 (!%p667_p10), %v296_v38, %v296_v38  ;;  %v298_v44 = vld [vmem:[%s1387_s29 + $0x78] sm:$0xff] (!%p667_p10) }
  0x79   : > { %v313_v45 = vmul.f32 (!%p667_p10), %v297_v41, %v297_v41  ;;  %v314_v47 = vmul.f32 (!%p667_p10), %v298_v44, %v298_v44 }
  0x7a   : > { %v317_v19 = vadd.f32 (!%p667_p10), %v316_v16, %v302_v12 }
  0x7c   : > { %v1395_v1 = vpop.eup %873  ;;  %v318_v22 = vadd.f32 (!%p667_p10), %v317_v19, %v303_v15 }
  0x7d   : > { %278 = vst [vmem:[%s1397_s9] sm:$0xff] %v1395_v1 }
  0x7e   : > { %v319_v25 = vadd.f32 %v318_v22, %v304_v18 }
  0x80   : > { %v320_v28 = vadd.f32 %v319_v25, %v305_v21 }
  0x82   : > { %v321_v31 = vadd.f32 %v320_v28, %v306_v24 }
  0x84   : > { %v322_v34 = vadd.f32 %v321_v31, %v307_v27 }
  0x86   : > { %v323_v37 = vadd.f32 %v322_v34, %v308_v30 }
  0x88   : > { %v324_v40 = vadd.f32 %v323_v37, %v309_v33 }
  0x8a   : > { %v325_v43 = vadd.f32 %v324_v40, %v310_v36 }
  0x8c   : > { %v326_v46 = vadd.f32 %v325_v43, %v311_v39 }
  0x8e   : > { %v327_v48 = vadd.f32 %v326_v46, %v312_v42 }
  0x90   : > { %v328_v49 = vadd.f32 %v327_v48, %v313_v45 }
  0x92   : > { %v329_v50 = vadd.f32 %v328_v49, %v314_v47 }
  0x94   : > { %v330_v51 = vrot.slane %v329_v50, 4 }
  0x96   : > { %v331_v52 = vadd.f32 %v330_v51, %v329_v50 }
  0x98   : > { %v332_v53 = vrot.slane %v331_v52, 2 }
  0x9a   : > { %v333_v54 = vadd.f32 %v332_v53, %v331_v52 }
  0x9c   : > { %v334_v55 = vrot.slane %v333_v54, 1 }
  0x9e   : > { %v335_v57 = vadd.f32 %v334_v55, %v333_v54 }
  0xa0   : > { %v337_v58 = vmul.f32 %v336_v56, %v335_v57 }
  0xa2   : > { %338 = vst [vmem:[#allocation2] sm:$0x1] %v337_v58 }
  0xa3 PF: > { %v344_v59 = vld [vmem:[%s1387_s29] sm:$0xff]  ;;  %v345_v60 = vld [vmem:[%s1387_s29 + $0x8] sm:$0xff]  ;;  %v346_v61 = vld [vmem:[%s1387_s29 + $0x10] sm:$0xff]  ;;  %v360_v62 = vmul.f32 %v1395_v1, %v1395_v1  ;;  %v1108_v63 = vmov 0.0|0.0   ;;  %vm1109_vm0 = vmmov 0   ;;  %v1110_v3 = vmov 0.0  }
  0xa4   : > { %728 = vmatprep.subr.bf16.mxu0 %v1108_v63  ;;  %v729_v0 = vpack.c.bf16 %v345_v60, %v344_v59  ;;  %v347_v2 = vld [vmem:[%s1387_s29 + $0x18] sm:$0xff]  ;;  %725 = vmatprep.mubr.msk.f32.mxu0 %vm1109_vm0, %v1110_v3  ;;  %v348_v5 = vld [vmem:[%s1387_s29 + $0x20] sm:$0xff]  ;;  %v349_v6 = vld [vmem:[%s1387_s29 + $0x28] sm:$0xff]  ;;  %s341_s14 = smul.f32 -2.0, %s1393_s12  ;;  %v364_v25 = vlaneseq  ;;  %s668_s1 = sshll.u32 %s1083_s0, 3  ;;  %v368_v30 = vstv %s1393_s12 }
  0xa5   : > { %361 = vadd.xlane.f32.xlu0 %v360_v62  ;;  %v732_v4 = vpack.c.bf16 %v347_v2, %v346_v61  ;;  %v735_v7 = vpack.c.bf16 %v349_v6, %v348_v5  ;;  %v350_v8 = vld [vmem:[%s1387_s29 + $0x30] sm:$0xff]  ;;  %v351_v9 = vld [vmem:[%s1387_s29 + $0x38] sm:$0xff]  ;;  %v352_v11 = vld [vmem:[%s1387_s29 + $0x40] sm:$0xff]  ;;  %v366_v27 = vstv %s668_s1  ;;  %v1111_v32 = vmov -1e+30   ;;  %p670_p0 = scmp.ne.s32.totalorder %s1083_s0, 2 }
  0xa6   : > { %730 = vmatpush3.bf16.msra.mxu0 %v729_v0  ;;  %v738_v10 = vpack.c.bf16 %v351_v9, %v350_v8  ;;  %v353_v12 = vld [vmem:[%s1387_s29 + $0x48] sm:$0xff]  ;;  %v354_v14 = vld [vmem:[%s1387_s29 + $0x50] sm:$0xff]  ;;  %v355_v15 = vld [vmem:[%s1387_s29 + $0x58] sm:$0xff]  ;;  %v342_v23 = vstv %s341_s14  ;;  %v365_v26 = vshrl.u32 %v364_v25, 7 }
  0xa7   : > { %731 = vmatprep.subr.bf16.mxu0 %v1108_v63  ;;  %v741_v13 = vpack.c.bf16 %v353_v12, %v352_v11  ;;  %v744_v16 = vpack.c.bf16 %v355_v15, %v354_v14  ;;  %v356_v17 = vld [vmem:[%s1387_s29 + $0x60] sm:$0xff]  ;;  %v357_v18 = vld [vmem:[%s1387_s29 + $0x68] sm:$0xff]  ;;  %v358_v20 = vld [vmem:[%s1387_s29 + $0x70] sm:$0xff]  ;;  %v343_v24 = vmul.f32 %v1395_v1, %v342_v23 }
  0xa8   : > { %v747_v19 = vpack.c.bf16 %v357_v18, %v356_v17  ;;  %v359_v21 = vld [vmem:[%s1387_s29 + $0x78] sm:$0xff]  ;;  %v367_v28 = vadd.s32 %v366_v27, %v365_v26  ;;  %v457_v44 = vld [vmem:[#allocation3] sm:$0x1]  ;;  %v467_v46 = vsub.s32 0, %v365_v26  ;;  %v459_v59 = vld [vmem:[#allocation4] sm:$0x1] }
  0xa9   : > { %v750_v22 = vpack.c.bf16 %v359_v21, %v358_v20  ;;  %v669_v36 = vld [vmem:[#allocation2] ss:$0 sm:$0xff] }
  0xaa   : > { %733 = vmatpush3.bf16.msra.mxu0 %v732_v4  ;;  %vm370_vm1 = vcmp.lt.s32.totalorder %v367_v28, 20 }
  0xab   : > { %734 = vmatprep.subr.bf16.mxu0 %v1108_v63  ;;  %v371_v33 = vsel %vm370_vm1, 0.0, %v1111_v32 }
  0xae   : > { %736 = vmatpush3.bf16.msra.mxu0 %v735_v7 }
  0xaf   : > { %737 = vmatprep.subr.bf16.mxu0 %v1108_v63 }
  0xb2   : > { %739 = vmatpush3.bf16.msra.mxu0 %v738_v10 }
  0xb3   : > { %740 = vmatprep.subr.bf16.mxu0 %v1108_v63 }
  0xb6   : > { %742 = vmatpush3.bf16.msra.mxu0 %v741_v13 }
  0xb7   : > { %743 = vmatprep.subr.bf16.mxu0 %v1108_v63 }
  0xba   : > { %745 = vmatpush3.bf16.msra.mxu0 %v744_v16 }
  0xbb   : > { %746 = vmatprep.subr.bf16.mxu0 %v1108_v63 }
  0xbe   : > { %748 = vmatpush3.bf16.msra.mxu0 %v747_v19 }
  0xbf   : > { %749 = vmatprep.subr.bf16.mxu0 %v1108_v63 }
  0xc2   : > { %751 = vmatpush3.bf16.msra.mxu0 %v750_v22 }
  0xc5   : > { %726 = vmatmul.mubr.f32.vlgmr.msra.gmra.mrb[0].mxu0 %v343_v24 }
 0x132   : > { %v362_v29 = vpop.xlane.xlu0 %361 }
 0x133   : > { %v369_v31 = vmul.f32 %v368_v30, %v362_v29 }
 0x135   : > { %v372_v34 = vadd.f32 %v371_v33, %v369_v31 }
 0x198   : > { %v439_v35 = vpop.f32.mrb[0].mxu0 }
 0x199   : > { %v440_v37 = vadd.f32 %v439_v35, %v372_v34  ;;  %v727_v38 = vpop.f32.mrb[1].mxu0 }
 0x19b   : > { %v450_v39 = vadd.f32 %v669_v36, %v440_v37 }
 0x19d   : > { %v451_v1 = vrot.slane %v450_v39, 4 }
 0x19f   : > { %v452_v40 = vmax.f32 %v450_v39, %v451_v1 }
 0x1a1   : > { %v453_v41 = vrot.slane %v452_v40, 2 }
 0x1a3   : > { %v454_v42 = vmax.f32 %v452_v40, %v453_v41 }
 0x1a5   : > { %v455_v43 = vrot.slane %v454_v42, 1 }
 0x1a7   : > { %v456_v45 = vmax.f32 %v454_v42, %v455_v43 }
 0x1a9   : > { %v458_v47 = vmax.f32 %v457_v44, %v456_v45 }
 0x1ab   : > { %v468_v48 = vrot.slane %v458_v47, %v467_v46  ;;  %481 = vst [vmem:[#allocation3] sm:$0x1] %v458_v47  ;;  %v460_v51 = vsub.f32 %v457_v44, %v458_v47 }
 0x1ad   : > { %v470_v49 = vsub.f32 %v450_v39, %v468_v48  ;;  %v461_v52 = vmul.f32 1.442695, %v460_v51 }
 0x1af   : > { %v471_v50 = vmul.f32 1.442695, %v470_v49 }
 0x1b1   : > { %875 = vpow2.f32 %v471_v50 }
 0x1b2   : > { %877 = vpow2.f32 %v461_v52  ;;  %v486_v3 = vld [vmem:[#allocation3] sm:$0x1] (!%p670_p0) }
 0x1bb   : > { %v876_v53 = vpop.eup %875 }
 0x1bc   : > { %v473_v54 = vrot.slane %v876_v53, 4  ;;  %v878_v58 = vpop.eup %877 }
 0x1bd   : > { %v463_v61 = vmul.f32 %v878_v58, %v459_v59 }
 0x1be   : > { %v474_v55 = vadd.f32 %v876_v53, %v473_v54 }
 0x1c0   : > { %v475_v56 = vrot.slane %v474_v55, 2 }
 0x1c2   : > { %v476_v57 = vadd.f32 %v475_v56, %v474_v55 }
 0x1c4   : > { %v477_v60 = vrot.slane %v476_v57, 1  ;;  %485 = sbr.rel (%p670_p0) target bundleno = 482 (0x1e2), region = 48 }
 0x1c6   : > { %v478_v62 = vadd.f32 %v477_v60, %v476_v57 }
 0x1c8   : > { %v479_v63 = vadd.f32 %v478_v62, %v463_v61 }
 0x1ca   : > { %480 = vst [vmem:[#allocation4] sm:$0x1] %v479_v63 }
 0x1d1   : > { %v487_v0 = vld [vmem:[#allocation4] sm:$0x1] }
 0x1d2   : > { %879 = vlog2.f32 %v487_v0 }
 0x1dc   : > { %v880_v2 = vpop.eup %879 }
 0x1dd   : > { %v489_v4 = vmul.f32 0.6931472, %v880_v2 }
 0x1df   : > { %v490_v5 = vadd.f32 %v489_v4, %v486_v3 }
 0x1e1   : > { %491 = vst [vmem:[%s274_s24] sm:$0x1] %v490_v5 }
 0x1e2 PF: > { %s672_s25 = sshll.u32 %s1083_s0, 7  ;;  %s510_s10 = sshll.u32 %s1397_s9, 4  ;;  %s511_s10 = int_to_ptr.vmem [resolvable:$true] %s510_s10 }
 0x1e3   : > { %s1449_s17 = scalar_lea.hbm %s1539_s3, %s672_s25  ;;  %s493_s27 = scalar_lea.sflag [#allocation8], %s1374_s7 }
 0x1e4   : > { %s941_s13 = scalar_lea.vmem %s511_s10, 128  ;;  %p1573_p5 = scmp.ne.s32.totalorder %s1562_s15, 0 }
 0x1e5   : > { %p942_p12 = scmp.ne.s32.totalorder %s511_s10, %s941_s13  ;;  %s1112_s8 = smov [#allocation11]  }
 0x1e6   : > { %s945_s29 = sshll.u32 %s1112_s8, 4  ;;  %s946_s29 = int_to_ptr.vmem [resolvable:$false] %s945_s29 }
 0x1e7   : > { %p943_p13 = pnand %p942_p12, %p1573_p5  ;;  %s947_s12 = scalar_lea.vmem %s946_s29, 256 }
 0x1e8   : > { %p948_p7 = scmp.lt.s32.totalorder %s511_s10, %s946_s29  ;;  %p949_p8 = scmp.lt.s32.totalorder %s947_s12, %s941_s13 }
 0x1e9   : > { %p944_p2 = pneg %p943_p13 }
 0x1ea   : > { %p950_p1 = por %p949_p8, %p948_p7 }
 0x1ec   : > { %p951_p4 = pnand %p950_p1, %p944_p2 }
 0x1ee   : > { %954 = shalt.err (!%p951_p4)
}
 0x1ef   : > { %s955_s0 = scalar_lea.hbm %s1449_s17, 128  ;;  %s959_s14 = scalar_lea.hbm %s1539_s3, 384 }
 0x1f0   : > { %p956_p11 = scmp.ne.s32.totalorder %s1449_s17, %s955_s0  ;;  %p960_p6 = scmp.lt.u32.totalorder %s1449_s17, %s1539_s3 }
 0x1f1   : > { %p961_p10 = scmp.lt.u32.totalorder %s959_s14, %s955_s0  ;;  %p963_p12 = scmp.lt.u32.totalorder %s955_s0, %s1449_s17 }
 0x1f2   : > { %p957_p3 = pnand %p956_p11, %p1573_p5 }
 0x1f3   : > { %p962_p0 = por %p961_p10, %p960_p6 }
 0x1f4   : > { %p958_p9 = pneg %p957_p3 }
 0x1f5   : > { %p964_p13 = por %p963_p12, %p962_p0 }
 0x1f7   : > { %p965_p2 = pnand %p964_p13, %p958_p9 }
 0x1f9   : > { %968 = shalt.err (!%p965_p2)
}
 0x1fa   : > { %756 = dma.vmem_to_hbm [thread:$0]  (%p1573_p5), %s511_s10, 128, %s1449_s17, %s493_s27  }
 0x1fb   : > { %s673_s28 = sshll.u32 %s1087_s23, 4  ;;  %s523_s11 = sshll.u32 %s274_s24, 4  ;;  %s524_s11 = int_to_ptr.vmem [resolvable:$true] %s523_s11 }
 0x1fc   : > { %s1476_s29 = scalar_lea.hbm %s1540_s4, %s673_s28  ;;  %s498_s12 = scalar_lea.sflag [#allocation13], %s1383_s30 }
 0x1fd   : > { %s969_s0 = scalar_lea.vmem %s524_s11, 16  ;;  %p1574_p8 = scmp.ne.s32.totalorder %s1564_s5, 0 }
 0x1fe   : > { %p970_p7 = scmp.ne.s32.totalorder %s524_s11, %s969_s0  ;;  %s1113_s15 = smov [#allocation12]  }
 0x1ff   : > { %s973_s7 = sshll.u32 %s1113_s15, 4  ;;  %s974_s7 = int_to_ptr.vmem [resolvable:$false] %s973_s7 }
 0x200   : > { %p971_p1 = pnand %p970_p7, %p1574_p8  ;;  %s975_s9 = scalar_lea.vmem %s974_s7, 32 }
 0x201   : > { %p976_p5 = scmp.lt.s32.totalorder %s524_s11, %s974_s7  ;;  %p977_p11 = scmp.lt.s32.totalorder %s975_s9, %s969_s0 }
 0x202   : > { %p972_p4 = pneg %p971_p1 }
 0x203   : > { %p978_p3 = por %p977_p11, %p976_p5 }
 0x205   : > { %p979_p9 = pnand %p978_p3, %p972_p4 }
 0x207   : > { %982 = shalt.err (!%p979_p9)
}
 0x208   : > { %s983_s23 = scalar_lea.hbm %s1476_s29, 16  ;;  %s987_s17 = scalar_lea.hbm %s1540_s4, 32 }
 0x209   : > { %p984_p6 = scmp.ne.s32.totalorder %s1476_s29, %s983_s23  ;;  %p988_p12 = scmp.lt.u32.totalorder %s1476_s29, %s1540_s4 }
 0x20a   : > { %p989_p13 = scmp.lt.u32.totalorder %s987_s17, %s983_s23  ;;  %p991_p7 = scmp.lt.u32.totalorder %s983_s23, %s1476_s29 }
 0x20b   : > { %p985_p10 = pnand %p984_p6, %p1574_p8 }
 0x20c   : > { %p990_p2 = por %p989_p13, %p988_p12 }
 0x20d   : > { %p986_p0 = pneg %p985_p10 }
 0x20e   : > { %p992_p1 = por %p991_p7, %p990_p2 }
 0x210   : > { %p993_p4 = pnand %p992_p1, %p986_p0 }
 0x212   : > { %996 = shalt.err (!%p993_p4)
}
 0x213   : > { %757 = dma.vmem_to_hbm [thread:$0]  (%p1574_p8), %s524_s11, 16, %s1476_s29, %s498_s12  }
 0x214 PF: > { %p775_p5 = scmp.ge.s32.totalorder %s1099_s26, 2  ;;  %s535_s14 = sand.u32 1, %s1071_s20  }
 0x215   : > { %p1575_p11 = scmp.ne.s32.totalorder %s1563_s16, 0  ;;  %s536_s1 = scalar_lea.sflag [#allocation8], %s535_s14 }
 0x217   : > { %p768_p3 = pnand %p775_p5, %p1575_p11 }
 0x219   : > { %1050 = dma.done.wait (!%p768_p3), %s536_s1, 128  }
 0x21a   : > { %1052 = vsyncadd (!%p768_p3), %s536_s1, 4294967168  ;;  %s1576_s25 = sld [smem:[#allocation18_spill]]  ;;  %p1577_p9 = scmp.ne.s32.totalorder %s1565_s6, 0 }
 0x21c   : > { %p771_p6 = pnand %p775_p5, %p1577_p9 }
 0x220   : > { %s544_s28 = sand.u32 1, %s1576_s25  }
 0x221   : > { %s545_s13 = scalar_lea.sflag [#allocation13], %s544_s28 }
 0x222   : > { %1054 = dma.done.wait (!%p771_p6), %s545_s13, 16  }
 0x223   : > { %1056 = vsyncadd (!%p771_p6), %s545_s13, 4294967280  ;;  %s28_s26 = sadd.s32 1, %s1099_s26   ;;  %s1578_s5 = sld [smem:[#allocation24_spill]] }
 0x224   : > { %p25_p8 = scmp.ge.s32.totalorder %s28_s26, 8   ;;  %s1579_s16 = sld [smem:[#allocation23_spill]] }
 0x225   : > { %s1580_s0 = sld [smem:[#allocation19_spill]]  ;;  %s1581_s23 = sld [smem:[#allocation20_spill]] }
 0x226   : > { %s1582_s24 = sld [smem:[#allocation21_spill]]  ;;  %s1583_s25 = sld [smem:[#allocation22_spill]] }
 0x227   : > { %s1584_s17 = smov %s1063_s18  ;;  %s1585_s18 = smov %s1067_s19 }
 0x228   : > { %s1587_s20 = smov %s1075_s21  ;;  %s1588_s21 = smov %s1079_s22 }
 0x229   : > { %s1586_s19 = smov %s1578_s5  ;;  %27 = sbr.rel (!%p25_p8) target bundleno = 16 (0x10), region = 115 }
 0x22a   : > { %s1589_s22 = smov %s1579_s16 }
 0x230   :  { %549 = vsyncpa [#allocation7], 1 }
 0x231   :  { %551 = vsyncpa [#allocation7 + $0x1], 1 }
 0x232   :  { %552 = vsyncpa [#allocation10], 1 }
 0x233   :  { %554 = vsyncpa [#allocation10 + $0x1], 1 }
 0x234   :  { %555 = vsyncpa [#allocation8], 1 }
 0x235   :  { %557 = vsyncpa [#allocation8 + $0x1], 1 }
 0x236   :  { %558 = vsyncpa [#allocation13], 1 }
 0x237   :  { %560 = vsyncpa [#allocation13 + $0x1], 1 }

</bundles_post_ra>
